<compile_context>
chip_gen: v7x
topology: tpu7x:2x2x1
jax: 0.10.0
libtpu: 0.0.40
codegen_flags: <defaults>
</compile_context>

<pallas_src>
import functools

import jax
import jax.numpy as jnp
from jax.experimental import pallas as pl
from jax.experimental.pallas import tpu as pltpu


def _round_up(x, m):
    return ((x + m - 1) // m) * m


def _sigmoid(x):
    # Single-EUP-op sigmoid (one tanh) instead of exp + reciprocal/divide.
    return 0.5 * jnp.tanh(0.5 * x) + 0.5


def _lstm_kernel(x_ref, wih_ref, whh_ref, b_ref, wlin_ref, blin_ref,
                 out_ref, xproj_ref, *, seq_len, batch, hidden):
    T, B, H = seq_len, batch, hidden

    # ---- Phase 1: input projection for ALL (b, t) rows in one MXU matmul, ----
    # ---- staged in a VMEM scratch (kept out of vregs during the recurrence). ----
    # x_ref: (B*T, I) batch-major rows, wih_ref: (I, Gp) -> xproj: (B*T, Gp)
    xproj_ref[...] = (
        jnp.dot(x_ref[...], wih_ref[...], preferred_element_type=jnp.float32)
        + b_ref[...])

    # ---- Phase 2: serial recurrence (T small & static -> fully unrolled). ----
    h = jnp.zeros((B, H), jnp.float32)
    c = jnp.zeros((B, H), jnp.float32)
    h_steps = []
    for t in range(T):
        # Gather this step's precomputed projection rows (row b*T + t).  Independent
        # of h, so these VMEM loads hide under the recurrent matmul / EUP chain.
        xg = jnp.concatenate(
            [xproj_ref[b * T + t:b * T + t + 1, :] for b in range(B)], axis=0)
        # Unpadded recurrent matmul; W_hh re-read from VMEM each step (never held
        # live across the unrolled loop).
        gates = xg + jnp.dot(h, whh_ref[...], preferred_element_type=jnp.float32)
        # PyTorch gate order i, f, g, o (32-lane sub-slices of the 128-lane group).
        i_g = _sigmoid(gates[:, 0 * H:1 * H])
        f_g = _sigmoid(gates[:, 1 * H:2 * H])
        g_g = jnp.tanh(gates[:, 2 * H:3 * H])
        o_g = _sigmoid(gates[:, 3 * H:4 * H])
        c = f_g * c + i_g * g_g
        h = o_g * jnp.tanh(c)
        h_steps.append(h)                                 # stays in registers (tiny)

    # ---- Phase 3: output head (Linear + Sigmoid) for all timesteps at once. ----
    # Assemble batch-major rows (b*T + t) directly in registers; no VMEM round-trip.
    h_all = jnp.concatenate(
        [h_steps[t][b:b + 1, :] for b in range(B) for t in range(T)], axis=0)
    y = _sigmoid(jnp.dot(h_all, wlin_ref[...], preferred_element_type=jnp.float32)
                 + blin_ref[...])
    out_ref[...] = y.astype(out_ref.dtype)


def prepare_lstm_params(w_ih, w_hh, b_ih, b_hh, w_lin, b_lin):
    """One-time (parameter-load-time) weight preprocessing.

    Pads the 4-gate group as a WHOLE to a multiple of 128 lanes (no-op when 4H is
    already a multiple of 128).  Hidden and output dims are NOT padded.
    """
    H = w_hh.shape[1]
    G = 4 * H
    Gp = _round_up(G, 128)
    wih_p = jnp.pad(jnp.transpose(w_ih), ((0, 0), (0, Gp - G)))          # (I, Gp)
    whh_p = jnp.pad(jnp.transpose(w_hh), ((0, 0), (0, Gp - G)))          # (H, Gp)
    b_p = jnp.pad((b_ih + b_hh).reshape(1, G), ((0, 0), (0, Gp - G)))    # (1, Gp)
    wlin_p = jnp.transpose(w_lin)                                        # (H, O)
    blin_p = b_lin.reshape(1, -1)                                        # (1, O)
    return wih_p, whh_p, b_p, wlin_p, blin_p


def lstm_forward(x_btI, params):
    """x_btI: (B, T, I) float32 (batch_first). Returns (B, T, O) float32."""
    wih_p, whh_p, b_p, wlin_p, blin_p = params
    B, T, _ = x_btI.shape
    H = whh_p.shape[0]
    O = wlin_p.shape[1]
    Gp = whh_p.shape[1]

    # Batch-major row flatten (row index = b*T + t): a free reshape, no transpose.
    x2d = x_btI.reshape(B * T, x_btI.shape[2])

    kernel = functools.partial(_lstm_kernel, seq_len=T, batch=B, hidden=H)

    out2d = pl.pallas_call(
        kernel,
        out_shape=jax.ShapeDtypeStruct((B * T, O), jnp.float32),
        in_specs=[pl.BlockSpec(memory_space=pltpu.MemorySpace.VMEM)] * 6,
        out_specs=pl.BlockSpec(memory_space=pltpu.MemorySpace.VMEM),
        scratch_shapes=[pltpu.VMEM((B * T, Gp), jnp.float32)],   # staged x-projection
    )(x2d, wih_p, whh_p, b_p, wlin_p, blin_p)

    return out2d.reshape(B, T, O)                        # free reshape back to (B,T,O)


def lstm_reference(x_btI, w_ih, w_hh, b_ih, b_hh, w_lin, b_lin):
    """Pure-JAX reference matching torch.nn.LSTM + Linear + Sigmoid semantics."""
    B, T, I = x_btI.shape
    H = w_hh.shape[1]

    def step(carry, x_t):
        h, c = carry
        gates = x_t @ w_ih.T + h @ w_hh.T + b_ih + b_hh
        i_g = jax.nn.sigmoid(gates[:, 0 * H:1 * H])
        f_g = jax.nn.sigmoid(gates[:, 1 * H:2 * H])
        g_g = jnp.tanh(gates[:, 2 * H:3 * H])
        o_g = jax.nn.sigmoid(gates[:, 3 * H:4 * H])
        c_new = f_g * c + i_g * g_g
        h_new = o_g * jnp.tanh(c_new)
        return (h_new, c_new), h_new

    init = (jnp.zeros((B, H), jnp.float32), jnp.zeros((B, H), jnp.float32))
    _, hs = jax.lax.scan(step, init, jnp.transpose(x_btI, (1, 0, 2)))
    hs = jnp.transpose(hs, (1, 0, 2))                      # (B, T, H)
    return jax.nn.sigmoid(hs @ w_lin.T + b_lin)


if __name__ == "__main__":
    # config: in_size=16, hidden_dims=32, out_size=8, bidir=False
    B, T, I, H, O = 2, 8, 16, 32, 8

    key = jax.random.PRNGKey(0)
    keys = jax.random.split(key, 8)
    bound = 1.0 / jnp.sqrt(jnp.float32(H))   # PyTorch default init range

    x = jax.random.normal(keys[0], (B, T, I), dtype=jnp.float32)
    w_ih = jax.random.uniform(keys[1], (4 * H, I), jnp.float32, -bound, bound)
    w_hh = jax.random.uniform(keys[2], (4 * H, H), jnp.float32, -bound, bound)
    b_ih = jax.random.uniform(keys[3], (4 * H,), jnp.float32, -bound, bound)
    b_hh = jax.random.uniform(keys[4], (4 * H,), jnp.float32, -bound, bound)
    w_lin = jax.random.uniform(keys[5], (O, H), jnp.float32, -bound, bound)
    b_lin = jax.random.uniform(keys[6], (O,), jnp.float32, -bound, bound)

    # Weight preprocessing happens ONCE, outside the per-call forward path.
    params = prepare_lstm_params(w_ih, w_hh, b_ih, b_hh, w_lin, b_lin)
    params = jax.tree_util.tree_map(jax.block_until_ready, params)

    fwd = jax.jit(lstm_forward)
    out = fwd(x, params)
    out = jax.block_until_ready(out)

    ref = lstm_reference(x, w_ih, w_hh, b_ih, b_hh, w_lin, b_lin)
    assert out.shape == (B, T, O), out.shape
    assert jnp.allclose(out, ref, atol=2e-5, rtol=2e-5), "mismatch vs JAX reference"

    print("KERNEL_OK")
</pallas_src>

<mosaic_0001>
module attributes {stable_mosaic.version = 11 : i64} {
  func.func @_lstm_kernel(%arg0: memref<16x16xf32, #tpu.memory_space<vmem>>, %arg1: memref<16x128xf32, #tpu.memory_space<vmem>>, %arg2: memref<32x128xf32, #tpu.memory_space<vmem>>, %arg3: memref<1x128xf32, #tpu.memory_space<vmem>>, %arg4: memref<32x8xf32, #tpu.memory_space<vmem>>, %arg5: memref<1x8xf32, #tpu.memory_space<vmem>>, %arg6: memref<16x8xf32, #tpu.memory_space<vmem>>, %arg7: memref<16x128xf32, #tpu.memory_space<vmem>>) attributes {dimension_semantics = [], scalar_prefetch = 0 : i64, scratch_operands = 1 : i64, tpu.core_type = #tpu.core_type<tc>} {
    %c0 = arith.constant 0 : index
    %c0_0 = arith.constant 0 : index
    %0 = vector.load %arg0[%c0, %c0_0] : memref<16x16xf32, #tpu.memory_space<vmem>>, vector<16x16xf32>
    %c0_1 = arith.constant 0 : index
    %c0_2 = arith.constant 0 : index
    %1 = vector.load %arg1[%c0_1, %c0_2] : memref<16x128xf32, #tpu.memory_space<vmem>>, vector<16x128xf32>
    %cst = arith.constant dense<0.000000e+00> : vector<16x128xf32>
    %2 = tpu.matmul %0, %1, %cst {dimension_numbers = #tpu.dot_dimension_numbers<[1], [0], [0], [1], [0, 0, 1, 1], [], []>} : vector<16x16xf32>, vector<16x128xf32>, vector<16x128xf32> -> vector<16x128xf32>
    %c0_3 = arith.constant 0 : index
    %c0_4 = arith.constant 0 : index
    %3 = vector.load %arg3[%c0_3, %c0_4] : memref<1x128xf32, #tpu.memory_space<vmem>>, vector<1x128xf32>
    %4 = vector.broadcast %3 : vector<1x128xf32> to vector<16x128xf32>
    %5 = arith.addf %2, %4 : vector<16x128xf32>
    %c0_5 = arith.constant 0 : index
    %c0_6 = arith.constant 0 : index
    %6 = vector.load %arg7[%c0_5, %c0_6] : memref<16x128xf32, #tpu.memory_space<vmem>>, vector<16x128xf32>
    tpu.vector_store %arg7[%c0_5, %c0_6], %5 {strides = array<i32>} : memref<16x128xf32, #tpu.memory_space<vmem>>, vector<16x128xf32>,
    %cst_7 = arith.constant 0.000000e+00 : f32
    %7 = vector.broadcast %cst_7 : f32 to vector<2x32xf32>
    %cst_8 = arith.constant 0.000000e+00 : f32
    %8 = vector.broadcast %cst_8 : f32 to vector<2x32xf32>
    %c0_9 = arith.constant 0 : index
    %c0_10 = arith.constant 0 : index
    %9 = vector.load %arg7[%c0_9, %c0_10] : memref<16x128xf32, #tpu.memory_space<vmem>>, vector<1x128xf32>
    %c8 = arith.constant 8 : index
    %c0_11 = arith.constant 0 : index
    %10 = vector.load %arg7[%c8, %c0_11] : memref<16x128xf32, #tpu.memory_space<vmem>>, vector<1x128xf32>
    %11 = tpu.concatenate %9, %10 in 0 : vector<1x128xf32>, vector<1x128xf32> -> vector<2x128xf32>
    %c0_12 = arith.constant 0 : index
    %c0_13 = arith.constant 0 : index
    %12 = vector.load %arg2[%c0_12, %c0_13] : memref<32x128xf32, #tpu.memory_space<vmem>>, vector<32x128xf32>
    %cst_14 = arith.constant dense<0.000000e+00> : vector<2x128xf32>
    %13 = tpu.matmul %7, %12, %cst_14 {dimension_numbers = #tpu.dot_dimension_numbers<[1], [0], [0], [1], [0, 0, 1, 1], [], []>} : vector<2x32xf32>, vector<32x128xf32>, vector<2x128xf32> -> vector<2x128xf32>
    %14 = arith.addf %11, %13 : vector<2x128xf32>
    %15 = vector.extract_strided_slice %14 {offsets = [0, 0], sizes = [2, 32], strides = [1, 1]} : vector<2x128xf32> to vector<2x32xf32>
    %cst_15 = arith.constant 5.000000e-01 : f32
    %16 = vector.broadcast %cst_15 : f32 to vector<2x32xf32>
    %17 = arith.mulf %16, %15 : vector<2x32xf32>
    %18 = math.tanh %17 : vector<2x32xf32>
    %cst_16 = arith.constant 5.000000e-01 : f32
    %19 = vector.broadcast %cst_16 : f32 to vector<2x32xf32>
    %20 = arith.mulf %19, %18 : vector<2x32xf32>
    %cst_17 = arith.constant 5.000000e-01 : f32
    %21 = vector.broadcast %cst_17 : f32 to vector<2x32xf32>
    %22 = arith.addf %20, %21 : vector<2x32xf32>
    %23 = vector.extract_strided_slice %14 {offsets = [0, 32], sizes = [2, 32], strides = [1, 1]} : vector<2x128xf32> to vector<2x32xf32>
    %cst_18 = arith.constant 5.000000e-01 : f32
    %24 = vector.broadcast %cst_18 : f32 to vector<2x32xf32>
    %25 = arith.mulf %24, %23 : vector<2x32xf32>
    %26 = math.tanh %25 : vector<2x32xf32>
    %cst_19 = arith.constant 5.000000e-01 : f32
    %27 = vector.broadcast %cst_19 : f32 to vector<2x32xf32>
    %28 = arith.mulf %27, %26 : vector<2x32xf32>
    %cst_20 = arith.constant 5.000000e-01 : f32
    %29 = vector.broadcast %cst_20 : f32 to vector<2x32xf32>
    %30 = arith.addf %28, %29 : vector<2x32xf32>
    %31 = vector.extract_strided_slice %14 {offsets = [0, 64], sizes = [2, 32], strides = [1, 1]} : vector<2x128xf32> to vector<2x32xf32>
    %32 = math.tanh %31 : vector<2x32xf32>
    %33 = vector.extract_strided_slice %14 {offsets = [0, 96], sizes = [2, 32], strides = [1, 1]} : vector<2x128xf32> to vector<2x32xf32>
    %cst_21 = arith.constant 5.000000e-01 : f32
    %34 = vector.broadcast %cst_21 : f32 to vector<2x32xf32>
    %35 = arith.mulf %34, %33 : vector<2x32xf32>
    %36 = math.tanh %35 : vector<2x32xf32>
    %cst_22 = arith.constant 5.000000e-01 : f32
    %37 = vector.broadcast %cst_22 : f32 to vector<2x32xf32>
    %38 = arith.mulf %37, %36 : vector<2x32xf32>
    %cst_23 = arith.constant 5.000000e-01 : f32
    %39 = vector.broadcast %cst_23 : f32 to vector<2x32xf32>
    %40 = arith.addf %38, %39 : vector<2x32xf32>
    %41 = arith.mulf %30, %8 : vector<2x32xf32>
    %42 = arith.mulf %22, %32 : vector<2x32xf32>
    %43 = arith.addf %41, %42 : vector<2x32xf32>
    %44 = math.tanh %43 : vector<2x32xf32>
    %45 = arith.mulf %40, %44 : vector<2x32xf32>
    %c1 = arith.constant 1 : index
    %c0_24 = arith.constant 0 : index
    %46 = vector.load %arg7[%c1, %c0_24] : memref<16x128xf32, #tpu.memory_space<vmem>>, vector<1x128xf32>
    %c9 = arith.constant 9 : index
    %c0_25 = arith.constant 0 : index
    %47 = vector.load %arg7[%c9, %c0_25] : memref<16x128xf32, #tpu.memory_space<vmem>>, vector<1x128xf32>
    %48 = tpu.concatenate %46, %47 in 0 : vector<1x128xf32>, vector<1x128xf32> -> vector<2x128xf32>
    %c0_26 = arith.constant 0 : index
    %c0_27 = arith.constant 0 : index
    %49 = vector.load %arg2[%c0_26, %c0_27] : memref<32x128xf32, #tpu.memory_space<vmem>>, vector<32x128xf32>
    %cst_28 = arith.constant dense<0.000000e+00> : vector<2x128xf32>
    %50 = tpu.matmul %45, %49, %cst_28 {dimension_numbers = #tpu.dot_dimension_numbers<[1], [0], [0], [1], [0, 0, 1, 1], [], []>} : vector<2x32xf32>, vector<32x128xf32>, vector<2x128xf32> -> vector<2x128xf32>
    %51 = arith.addf %48, %50 : vector<2x128xf32>
    %52 = vector.extract_strided_slice %51 {offsets = [0, 0], sizes = [2, 32], strides = [1, 1]} : vector<2x128xf32> to vector<2x32xf32>
    %cst_29 = arith.constant 5.000000e-01 : f32
    %53 = vector.broadcast %cst_29 : f32 to vector<2x32xf32>
    %54 = arith.mulf %53, %52 : vector<2x32xf32>
    %55 = math.tanh %54 : vector<2x32xf32>
    %cst_30 = arith.constant 5.000000e-01 : f32
    %56 = vector.broadcast %cst_30 : f32 to vector<2x32xf32>
    %57 = arith.mulf %56, %55 : vector<2x32xf32>
    %cst_31 = arith.constant 5.000000e-01 : f32
    %58 = vector.broadcast %cst_31 : f32 to vector<2x32xf32>
    %59 = arith.addf %57, %58 : vector<2x32xf32>
    %60 = vector.extract_strided_slice %51 {offsets = [0, 32], sizes = [2, 32], strides = [1, 1]} : vector<2x128xf32> to vector<2x32xf32>
    %cst_32 = arith.constant 5.000000e-01 : f32
    %61 = vector.broadcast %cst_32 : f32 to vector<2x32xf32>
    %62 = arith.mulf %61, %60 : vector<2x32xf32>
    %63 = math.tanh %62 : vector<2x32xf32>
    %cst_33 = arith.constant 5.000000e-01 : f32
    %64 = vector.broadcast %cst_33 : f32 to vector<2x32xf32>
    %65 = arith.mulf %64, %63 : vector<2x32xf32>
    %cst_34 = arith.constant 5.000000e-01 : f32
    %66 = vector.broadcast %cst_34 : f32 to vector<2x32xf32>
    %67 = arith.addf %65, %66 : vector<2x32xf32>
    %68 = vector.extract_strided_slice %51 {offsets = [0, 64], sizes = [2, 32], strides = [1, 1]} : vector<2x128xf32> to vector<2x32xf32>
    %69 = math.tanh %68 : vector<2x32xf32>
    %70 = vector.extract_strided_slice %51 {offsets = [0, 96], sizes = [2, 32], strides = [1, 1]} : vector<2x128xf32> to vector<2x32xf32>
    %cst_35 = arith.constant 5.000000e-01 : f32
    %71 = vector.broadcast %cst_35 : f32 to vector<2x32xf32>
    %72 = arith.mulf %71, %70 : vector<2x32xf32>
    %73 = math.tanh %72 : vector<2x32xf32>
    %cst_36 = arith.constant 5.000000e-01 : f32
    %74 = vector.broadcast %cst_36 : f32 to vector<2x32xf32>
    %75 = arith.mulf %74, %73 : vector<2x32xf32>
    %cst_37 = arith.constant 5.000000e-01 : f32
    %76 = vector.broadcast %cst_37 : f32 to vector<2x32xf32>
    %77 = arith.addf %75, %76 : vector<2x32xf32>
    %78 = arith.mulf %67, %43 : vector<2x32xf32>
    %79 = arith.mulf %59, %69 : vector<2x32xf32>
    %80 = arith.addf %78, %79 : vector<2x32xf32>
    %81 = math.tanh %80 : vector<2x32xf32>
    %82 = arith.mulf %77, %81 : vector<2x32xf32>
    %c2 = arith.constant 2 : index
    %c0_38 = arith.constant 0 : index
    %83 = vector.load %arg7[%c2, %c0_38] : memref<16x128xf32, #tpu.memory_space<vmem>>, vector<1x128xf32>
    %c10 = arith.constant 10 : index
    %c0_39 = arith.constant 0 : index
    %84 = vector.load %arg7[%c10, %c0_39] : memref<16x128xf32, #tpu.memory_space<vmem>>, vector<1x128xf32>
    %85 = tpu.concatenate %83, %84 in 0 : vector<1x128xf32>, vector<1x128xf32> -> vector<2x128xf32>
    %c0_40 = arith.constant 0 : index
    %c0_41 = arith.constant 0 : index
    %86 = vector.load %arg2[%c0_40, %c0_41] : memref<32x128xf32, #tpu.memory_space<vmem>>, vector<32x128xf32>
    %cst_42 = arith.constant dense<0.000000e+00> : vector<2x128xf32>
    %87 = tpu.matmul %82, %86, %cst_42 {dimension_numbers = #tpu.dot_dimension_numbers<[1], [0], [0], [1], [0, 0, 1, 1], [], []>} : vector<2x32xf32>, vector<32x128xf32>, vector<2x128xf32> -> vector<2x128xf32>
    %88 = arith.addf %85, %87 : vector<2x128xf32>
    %89 = vector.extract_strided_slice %88 {offsets = [0, 0], sizes = [2, 32], strides = [1, 1]} : vector<2x128xf32> to vector<2x32xf32>
    %cst_43 = arith.constant 5.000000e-01 : f32
    %90 = vector.broadcast %cst_43 : f32 to vector<2x32xf32>
    %91 = arith.mulf %90, %89 : vector<2x32xf32>
    %92 = math.tanh %91 : vector<2x32xf32>
    %cst_44 = arith.constant 5.000000e-01 : f32
    %93 = vector.broadcast %cst_44 : f32 to vector<2x32xf32>
    %94 = arith.mulf %93, %92 : vector<2x32xf32>
    %cst_45 = arith.constant 5.000000e-01 : f32
    %95 = vector.broadcast %cst_45 : f32 to vector<2x32xf32>
    %96 = arith.addf %94, %95 : vector<2x32xf32>
    %97 = vector.extract_strided_slice %88 {offsets = [0, 32], sizes = [2, 32], strides = [1, 1]} : vector<2x128xf32> to vector<2x32xf32>
    %cst_46 = arith.constant 5.000000e-01 : f32
    %98 = vector.broadcast %cst_46 : f32 to vector<2x32xf32>
    %99 = arith.mulf %98, %97 : vector<2x32xf32>
    %100 = math.tanh %99 : vector<2x32xf32>
    %cst_47 = arith.constant 5.000000e-01 : f32
    %101 = vector.broadcast %cst_47 : f32 to vector<2x32xf32>
    %102 = arith.mulf %101, %100 : vector<2x32xf32>
    %cst_48 = arith.constant 5.000000e-01 : f32
    %103 = vector.broadcast %cst_48 : f32 to vector<2x32xf32>
    %104 = arith.addf %102, %103 : vector<2x32xf32>
    %105 = vector.extract_strided_slice %88 {offsets = [0, 64], sizes = [2, 32], strides = [1, 1]} : vector<2x128xf32> to vector<2x32xf32>
    %106 = math.tanh %105 : vector<2x32xf32>
    %107 = vector.extract_strided_slice %88 {offsets = [0, 96], sizes = [2, 32], strides = [1, 1]} : vector<2x128xf32> to vector<2x32xf32>
    %cst_49 = arith.constant 5.000000e-01 : f32
    %108 = vector.broadcast %cst_49 : f32 to vector<2x32xf32>
    %109 = arith.mulf %108, %107 : vector<2x32xf32>
    %110 = math.tanh %109 : vector<2x32xf32>
    %cst_50 = arith.constant 5.000000e-01 : f32
    %111 = vector.broadcast %cst_50 : f32 to vector<2x32xf32>
    %112 = arith.mulf %111, %110 : vector<2x32xf32>
    %cst_51 = arith.constant 5.000000e-01 : f32
    %113 = vector.broadcast %cst_51 : f32 to vector<2x32xf32>
    %114 = arith.addf %112, %113 : vector<2x32xf32>
    %115 = arith.mulf %104, %80 : vector<2x32xf32>
    %116 = arith.mulf %96, %106 : vector<2x32xf32>
    %117 = arith.addf %115, %116 : vector<2x32xf32>
    %118 = math.tanh %117 : vector<2x32xf32>
    %119 = arith.mulf %114, %118 : vector<2x32xf32>
    %c3 = arith.constant 3 : index
    %c0_52 = arith.constant 0 : index
    %120 = vector.load %arg7[%c3, %c0_52] : memref<16x128xf32, #tpu.memory_space<vmem>>, vector<1x128xf32>
    %c11 = arith.constant 11 : index
    %c0_53 = arith.constant 0 : index
    %121 = vector.load %arg7[%c11, %c0_53] : memref<16x128xf32, #tpu.memory_space<vmem>>, vector<1x128xf32>
    %122 = tpu.concatenate %120, %121 in 0 : vector<1x128xf32>, vector<1x128xf32> -> vector<2x128xf32>
    %c0_54 = arith.constant 0 : index
    %c0_55 = arith.constant 0 : index
    %123 = vector.load %arg2[%c0_54, %c0_55] : memref<32x128xf32, #tpu.memory_space<vmem>>, vector<32x128xf32>
    %cst_56 = arith.constant dense<0.000000e+00> : vector<2x128xf32>
    %124 = tpu.matmul %119, %123, %cst_56 {dimension_numbers = #tpu.dot_dimension_numbers<[1], [0], [0], [1], [0, 0, 1, 1], [], []>} : vector<2x32xf32>, vector<32x128xf32>, vector<2x128xf32> -> vector<2x128xf32>
    %125 = arith.addf %122, %124 : vector<2x128xf32>
    %126 = vector.extract_strided_slice %125 {offsets = [0, 0], sizes = [2, 32], strides = [1, 1]} : vector<2x128xf32> to vector<2x32xf32>
    %cst_57 = arith.constant 5.000000e-01 : f32
    %127 = vector.broadcast %cst_57 : f32 to vector<2x32xf32>
    %128 = arith.mulf %127, %126 : vector<2x32xf32>
    %129 = math.tanh %128 : vector<2x32xf32>
    %cst_58 = arith.constant 5.000000e-01 : f32
    %130 = vector.broadcast %cst_58 : f32 to vector<2x32xf32>
    %131 = arith.mulf %130, %129 : vector<2x32xf32>
    %cst_59 = arith.constant 5.000000e-01 : f32
    %132 = vector.broadcast %cst_59 : f32 to vector<2x32xf32>
    %133 = arith.addf %131, %132 : vector<2x32xf32>
    %134 = vector.extract_strided_slice %125 {offsets = [0, 32], sizes = [2, 32], strides = [1, 1]} : vector<2x128xf32> to vector<2x32xf32>
    %cst_60 = arith.constant 5.000000e-01 : f32
    %135 = vector.broadcast %cst_60 : f32 to vector<2x32xf32>
    %136 = arith.mulf %135, %134 : vector<2x32xf32>
    %137 = math.tanh %136 : vector<2x32xf32>
    %cst_61 = arith.constant 5.000000e-01 : f32
    %138 = vector.broadcast %cst_61 : f32 to vector<2x32xf32>
    %139 = arith.mulf %138, %137 : vector<2x32xf32>
    %cst_62 = arith.constant 5.000000e-01 : f32
    %140 = vector.broadcast %cst_62 : f32 to vector<2x32xf32>
    %141 = arith.addf %139, %140 : vector<2x32xf32>
    %142 = vector.extract_strided_slice %125 {offsets = [0, 64], sizes = [2, 32], strides = [1, 1]} : vector<2x128xf32> to vector<2x32xf32>
    %143 = math.tanh %142 : vector<2x32xf32>
    %144 = vector.extract_strided_slice %125 {offsets = [0, 96], sizes = [2, 32], strides = [1, 1]} : vector<2x128xf32> to vector<2x32xf32>
    %cst_63 = arith.constant 5.000000e-01 : f32
    %145 = vector.broadcast %cst_63 : f32 to vector<2x32xf32>
    %146 = arith.mulf %145, %144 : vector<2x32xf32>
    %147 = math.tanh %146 : vector<2x32xf32>
    %cst_64 = arith.constant 5.000000e-01 : f32
    %148 = vector.broadcast %cst_64 : f32 to vector<2x32xf32>
    %149 = arith.mulf %148, %147 : vector<2x32xf32>
    %cst_65 = arith.constant 5.000000e-01 : f32
    %150 = vector.broadcast %cst_65 : f32 to vector<2x32xf32>
    %151 = arith.addf %149, %150 : vector<2x32xf32>
    %152 = arith.mulf %141, %117 : vector<2x32xf32>
    %153 = arith.mulf %133, %143 : vector<2x32xf32>
    %154 = arith.addf %152, %153 : vector<2x32xf32>
    %155 = math.tanh %154 : vector<2x32xf32>
    %156 = arith.mulf %151, %155 : vector<2x32xf32>
    %c4 = arith.constant 4 : index
    %c0_66 = arith.constant 0 : index
    %157 = vector.load %arg7[%c4, %c0_66] : memref<16x128xf32, #tpu.memory_space<vmem>>, vector<1x128xf32>
    %c12 = arith.constant 12 : index
    %c0_67 = arith.constant 0 : index
    %158 = vector.load %arg7[%c12, %c0_67] : memref<16x128xf32, #tpu.memory_space<vmem>>, vector<1x128xf32>
    %159 = tpu.concatenate %157, %158 in 0 : vector<1x128xf32>, vector<1x128xf32> -> vector<2x128xf32>
    %c0_68 = arith.constant 0 : index
    %c0_69 = arith.constant 0 : index
    %160 = vector.load %arg2[%c0_68, %c0_69] : memref<32x128xf32, #tpu.memory_space<vmem>>, vector<32x128xf32>
    %cst_70 = arith.constant dense<0.000000e+00> : vector<2x128xf32>
    %161 = tpu.matmul %156, %160, %cst_70 {dimension_numbers = #tpu.dot_dimension_numbers<[1], [0], [0], [1], [0, 0, 1, 1], [], []>} : vector<2x32xf32>, vector<32x128xf32>, vector<2x128xf32> -> vector<2x128xf32>
    %162 = arith.addf %159, %161 : vector<2x128xf32>
    %163 = vector.extract_strided_slice %162 {offsets = [0, 0], sizes = [2, 32], strides = [1, 1]} : vector<2x128xf32> to vector<2x32xf32>
    %cst_71 = arith.constant 5.000000e-01 : f32
    %164 = vector.broadcast %cst_71 : f32 to vector<2x32xf32>
    %165 = arith.mulf %164, %163 : vector<2x32xf32>
    %166 = math.tanh %165 : vector<2x32xf32>
    %cst_72 = arith.constant 5.000000e-01 : f32
    %167 = vector.broadcast %cst_72 : f32 to vector<2x32xf32>
    %168 = arith.mulf %167, %166 : vector<2x32xf32>
    %cst_73 = arith.constant 5.000000e-01 : f32
    %169 = vector.broadcast %cst_73 : f32 to vector<2x32xf32>
    %170 = arith.addf %168, %169 : vector<2x32xf32>
    %171 = vector.extract_strided_slice %162 {offsets = [0, 32], sizes = [2, 32], strides = [1, 1]} : vector<2x128xf32> to vector<2x32xf32>
    %cst_74 = arith.constant 5.000000e-01 : f32
    %172 = vector.broadcast %cst_74 : f32 to vector<2x32xf32>
    %173 = arith.mulf %172, %171 : vector<2x32xf32>
    %174 = math.tanh %173 : vector<2x32xf32>
    %cst_75 = arith.constant 5.000000e-01 : f32
    %175 = vector.broadcast %cst_75 : f32 to vector<2x32xf32>
    %176 = arith.mulf %175, %174 : vector<2x32xf32>
    %cst_76 = arith.constant 5.000000e-01 : f32
    %177 = vector.broadcast %cst_76 : f32 to vector<2x32xf32>
    %178 = arith.addf %176, %177 : vector<2x32xf32>
    %179 = vector.extract_strided_slice %162 {offsets = [0, 64], sizes = [2, 32], strides = [1, 1]} : vector<2x128xf32> to vector<2x32xf32>
    %180 = math.tanh %179 : vector<2x32xf32>
    %181 = vector.extract_strided_slice %162 {offsets = [0, 96], sizes = [2, 32], strides = [1, 1]} : vector<2x128xf32> to vector<2x32xf32>
    %cst_77 = arith.constant 5.000000e-01 : f32
    %182 = vector.broadcast %cst_77 : f32 to vector<2x32xf32>
    %183 = arith.mulf %182, %181 : vector<2x32xf32>
    %184 = math.tanh %183 : vector<2x32xf32>
    %cst_78 = arith.constant 5.000000e-01 : f32
    %185 = vector.broadcast %cst_78 : f32 to vector<2x32xf32>
    %186 = arith.mulf %185, %184 : vector<2x32xf32>
    %cst_79 = arith.constant 5.000000e-01 : f32
    %187 = vector.broadcast %cst_79 : f32 to vector<2x32xf32>
    %188 = arith.addf %186, %187 : vector<2x32xf32>
    %189 = arith.mulf %178, %154 : vector<2x32xf32>
    %190 = arith.mulf %170, %180 : vector<2x32xf32>
    %191 = arith.addf %189, %190 : vector<2x32xf32>
    %192 = math.tanh %191 : vector<2x32xf32>
    %193 = arith.mulf %188, %192 : vector<2x32xf32>
    %c5 = arith.constant 5 : index
    %c0_80 = arith.constant 0 : index
    %194 = vector.load %arg7[%c5, %c0_80] : memref<16x128xf32, #tpu.memory_space<vmem>>, vector<1x128xf32>
    %c13 = arith.constant 13 : index
    %c0_81 = arith.constant 0 : index
    %195 = vector.load %arg7[%c13, %c0_81] : memref<16x128xf32, #tpu.memory_space<vmem>>, vector<1x128xf32>
    %196 = tpu.concatenate %194, %195 in 0 : vector<1x128xf32>, vector<1x128xf32> -> vector<2x128xf32>
    %c0_82 = arith.constant 0 : index
    %c0_83 = arith.constant 0 : index
    %197 = vector.load %arg2[%c0_82, %c0_83] : memref<32x128xf32, #tpu.memory_space<vmem>>, vector<32x128xf32>
    %cst_84 = arith.constant dense<0.000000e+00> : vector<2x128xf32>
    %198 = tpu.matmul %193, %197, %cst_84 {dimension_numbers = #tpu.dot_dimension_numbers<[1], [0], [0], [1], [0, 0, 1, 1], [], []>} : vector<2x32xf32>, vector<32x128xf32>, vector<2x128xf32> -> vector<2x128xf32>
    %199 = arith.addf %196, %198 : vector<2x128xf32>
    %200 = vector.extract_strided_slice %199 {offsets = [0, 0], sizes = [2, 32], strides = [1, 1]} : vector<2x128xf32> to vector<2x32xf32>
    %cst_85 = arith.constant 5.000000e-01 : f32
    %201 = vector.broadcast %cst_85 : f32 to vector<2x32xf32>
    %202 = arith.mulf %201, %200 : vector<2x32xf32>
    %203 = math.tanh %202 : vector<2x32xf32>
    %cst_86 = arith.constant 5.000000e-01 : f32
    %204 = vector.broadcast %cst_86 : f32 to vector<2x32xf32>
    %205 = arith.mulf %204, %203 : vector<2x32xf32>
    %cst_87 = arith.constant 5.000000e-01 : f32
    %206 = vector.broadcast %cst_87 : f32 to vector<2x32xf32>
    %207 = arith.addf %205, %206 : vector<2x32xf32>
    %208 = vector.extract_strided_slice %199 {offsets = [0, 32], sizes = [2, 32], strides = [1, 1]} : vector<2x128xf32> to vector<2x32xf32>
    %cst_88 = arith.constant 5.000000e-01 : f32
    %209 = vector.broadcast %cst_88 : f32 to vector<2x32xf32>
    %210 = arith.mulf %209, %208 : vector<2x32xf32>
    %211 = math.tanh %210 : vector<2x32xf32>
    %cst_89 = arith.constant 5.000000e-01 : f32
    %212 = vector.broadcast %cst_89 : f32 to vector<2x32xf32>
    %213 = arith.mulf %212, %211 : vector<2x32xf32>
    %cst_90 = arith.constant 5.000000e-01 : f32
    %214 = vector.broadcast %cst_90 : f32 to vector<2x32xf32>
    %215 = arith.addf %213, %214 : vector<2x32xf32>
    %216 = vector.extract_strided_slice %199 {offsets = [0, 64], sizes = [2, 32], strides = [1, 1]} : vector<2x128xf32> to vector<2x32xf32>
    %217 = math.tanh %216 : vector<2x32xf32>
    %218 = vector.extract_strided_slice %199 {offsets = [0, 96], sizes = [2, 32], strides = [1, 1]} : vector<2x128xf32> to vector<2x32xf32>
    %cst_91 = arith.constant 5.000000e-01 : f32
    %219 = vector.broadcast %cst_91 : f32 to vector<2x32xf32>
    %220 = arith.mulf %219, %218 : vector<2x32xf32>
    %221 = math.tanh %220 : vector<2x32xf32>
    %cst_92 = arith.constant 5.000000e-01 : f32
    %222 = vector.broadcast %cst_92 : f32 to vector<2x32xf32>
    %223 = arith.mulf %222, %221 : vector<2x32xf32>
    %cst_93 = arith.constant 5.000000e-01 : f32
    %224 = vector.broadcast %cst_93 : f32 to vector<2x32xf32>
    %225 = arith.addf %223, %224 : vector<2x32xf32>
    %226 = arith.mulf %215, %191 : vector<2x32xf32>
    %227 = arith.mulf %207, %217 : vector<2x32xf32>
    %228 = arith.addf %226, %227 : vector<2x32xf32>
    %229 = math.tanh %228 : vector<2x32xf32>
    %230 = arith.mulf %225, %229 : vector<2x32xf32>
    %c6 = arith.constant 6 : index
    %c0_94 = arith.constant 0 : index
    %231 = vector.load %arg7[%c6, %c0_94] : memref<16x128xf32, #tpu.memory_space<vmem>>, vector<1x128xf32>
    %c14 = arith.constant 14 : index
    %c0_95 = arith.constant 0 : index
    %232 = vector.load %arg7[%c14, %c0_95] : memref<16x128xf32, #tpu.memory_space<vmem>>, vector<1x128xf32>
    %233 = tpu.concatenate %231, %232 in 0 : vector<1x128xf32>, vector<1x128xf32> -> vector<2x128xf32>
    %c0_96 = arith.constant 0 : index
    %c0_97 = arith.constant 0 : index
    %234 = vector.load %arg2[%c0_96, %c0_97] : memref<32x128xf32, #tpu.memory_space<vmem>>, vector<32x128xf32>
    %cst_98 = arith.constant dense<0.000000e+00> : vector<2x128xf32>
    %235 = tpu.matmul %230, %234, %cst_98 {dimension_numbers = #tpu.dot_dimension_numbers<[1], [0], [0], [1], [0, 0, 1, 1], [], []>} : vector<2x32xf32>, vector<32x128xf32>, vector<2x128xf32> -> vector<2x128xf32>
    %236 = arith.addf %233, %235 : vector<2x128xf32>
    %237 = vector.extract_strided_slice %236 {offsets = [0, 0], sizes = [2, 32], strides = [1, 1]} : vector<2x128xf32> to vector<2x32xf32>
    %cst_99 = arith.constant 5.000000e-01 : f32
    %238 = vector.broadcast %cst_99 : f32 to vector<2x32xf32>
    %239 = arith.mulf %238, %237 : vector<2x32xf32>
    %240 = math.tanh %239 : vector<2x32xf32>
    %cst_100 = arith.constant 5.000000e-01 : f32
    %241 = vector.broadcast %cst_100 : f32 to vector<2x32xf32>
    %242 = arith.mulf %241, %240 : vector<2x32xf32>
    %cst_101 = arith.constant 5.000000e-01 : f32
    %243 = vector.broadcast %cst_101 : f32 to vector<2x32xf32>
    %244 = arith.addf %242, %243 : vector<2x32xf32>
    %245 = vector.extract_strided_slice %236 {offsets = [0, 32], sizes = [2, 32], strides = [1, 1]} : vector<2x128xf32> to vector<2x32xf32>
    %cst_102 = arith.constant 5.000000e-01 : f32
    %246 = vector.broadcast %cst_102 : f32 to vector<2x32xf32>
    %247 = arith.mulf %246, %245 : vector<2x32xf32>
    %248 = math.tanh %247 : vector<2x32xf32>
    %cst_103 = arith.constant 5.000000e-01 : f32
    %249 = vector.broadcast %cst_103 : f32 to vector<2x32xf32>
    %250 = arith.mulf %249, %248 : vector<2x32xf32>
    %cst_104 = arith.constant 5.000000e-01 : f32
    %251 = vector.broadcast %cst_104 : f32 to vector<2x32xf32>
    %252 = arith.addf %250, %251 : vector<2x32xf32>
    %253 = vector.extract_strided_slice %236 {offsets = [0, 64], sizes = [2, 32], strides = [1, 1]} : vector<2x128xf32> to vector<2x32xf32>
    %254 = math.tanh %253 : vector<2x32xf32>
    %255 = vector.extract_strided_slice %236 {offsets = [0, 96], sizes = [2, 32], strides = [1, 1]} : vector<2x128xf32> to vector<2x32xf32>
    %cst_105 = arith.constant 5.000000e-01 : f32
    %256 = vector.broadcast %cst_105 : f32 to vector<2x32xf32>
    %257 = arith.mulf %256, %255 : vector<2x32xf32>
    %258 = math.tanh %257 : vector<2x32xf32>
    %cst_106 = arith.constant 5.000000e-01 : f32
    %259 = vector.broadcast %cst_106 : f32 to vector<2x32xf32>
    %260 = arith.mulf %259, %258 : vector<2x32xf32>
    %cst_107 = arith.constant 5.000000e-01 : f32
    %261 = vector.broadcast %cst_107 : f32 to vector<2x32xf32>
    %262 = arith.addf %260, %261 : vector<2x32xf32>
    %263 = arith.mulf %252, %228 : vector<2x32xf32>
    %264 = arith.mulf %244, %254 : vector<2x32xf32>
    %265 = arith.addf %263, %264 : vector<2x32xf32>
    %266 = math.tanh %265 : vector<2x32xf32>
    %267 = arith.mulf %262, %266 : vector<2x32xf32>
    %c7 = arith.constant 7 : index
    %c0_108 = arith.constant 0 : index
    %268 = vector.load %arg7[%c7, %c0_108] : memref<16x128xf32, #tpu.memory_space<vmem>>, vector<1x128xf32>
    %c15 = arith.constant 15 : index
    %c0_109 = arith.constant 0 : index
    %269 = vector.load %arg7[%c15, %c0_109] : memref<16x128xf32, #tpu.memory_space<vmem>>, vector<1x128xf32>
    %270 = tpu.concatenate %268, %269 in 0 : vector<1x128xf32>, vector<1x128xf32> -> vector<2x128xf32>
    %c0_110 = arith.constant 0 : index
    %c0_111 = arith.constant 0 : index
    %271 = vector.load %arg2[%c0_110, %c0_111] : memref<32x128xf32, #tpu.memory_space<vmem>>, vector<32x128xf32>
    %cst_112 = arith.constant dense<0.000000e+00> : vector<2x128xf32>
    %272 = tpu.matmul %267, %271, %cst_112 {dimension_numbers = #tpu.dot_dimension_numbers<[1], [0], [0], [1], [0, 0, 1, 1], [], []>} : vector<2x32xf32>, vector<32x128xf32>, vector<2x128xf32> -> vector<2x128xf32>
    %273 = arith.addf %270, %272 : vector<2x128xf32>
    %274 = vector.extract_strided_slice %273 {offsets = [0, 0], sizes = [2, 32], strides = [1, 1]} : vector<2x128xf32> to vector<2x32xf32>
    %cst_113 = arith.constant 5.000000e-01 : f32
    %275 = vector.broadcast %cst_113 : f32 to vector<2x32xf32>
    %276 = arith.mulf %275, %274 : vector<2x32xf32>
    %277 = math.tanh %276 : vector<2x32xf32>
    %cst_114 = arith.constant 5.000000e-01 : f32
    %278 = vector.broadcast %cst_114 : f32 to vector<2x32xf32>
    %279 = arith.mulf %278, %277 : vector<2x32xf32>
    %cst_115 = arith.constant 5.000000e-01 : f32
    %280 = vector.broadcast %cst_115 : f32 to vector<2x32xf32>
    %281 = arith.addf %279, %280 : vector<2x32xf32>
    %282 = vector.extract_strided_slice %273 {offsets = [0, 32], sizes = [2, 32], strides = [1, 1]} : vector<2x128xf32> to vector<2x32xf32>
    %cst_116 = arith.constant 5.000000e-01 : f32
    %283 = vector.broadcast %cst_116 : f32 to vector<2x32xf32>
    %284 = arith.mulf %283, %282 : vector<2x32xf32>
    %285 = math.tanh %284 : vector<2x32xf32>
    %cst_117 = arith.constant 5.000000e-01 : f32
    %286 = vector.broadcast %cst_117 : f32 to vector<2x32xf32>
    %287 = arith.mulf %286, %285 : vector<2x32xf32>
    %cst_118 = arith.constant 5.000000e-01 : f32
    %288 = vector.broadcast %cst_118 : f32 to vector<2x32xf32>
    %289 = arith.addf %287, %288 : vector<2x32xf32>
    %290 = vector.extract_strided_slice %273 {offsets = [0, 64], sizes = [2, 32], strides = [1, 1]} : vector<2x128xf32> to vector<2x32xf32>
    %291 = math.tanh %290 : vector<2x32xf32>
    %292 = vector.extract_strided_slice %273 {offsets = [0, 96], sizes = [2, 32], strides = [1, 1]} : vector<2x128xf32> to vector<2x32xf32>
    %cst_119 = arith.constant 5.000000e-01 : f32
    %293 = vector.broadcast %cst_119 : f32 to vector<2x32xf32>
    %294 = arith.mulf %293, %292 : vector<2x32xf32>
    %295 = math.tanh %294 : vector<2x32xf32>
    %cst_120 = arith.constant 5.000000e-01 : f32
    %296 = vector.broadcast %cst_120 : f32 to vector<2x32xf32>
    %297 = arith.mulf %296, %295 : vector<2x32xf32>
    %cst_121 = arith.constant 5.000000e-01 : f32
    %298 = vector.broadcast %cst_121 : f32 to vector<2x32xf32>
    %299 = arith.addf %297, %298 : vector<2x32xf32>
    %300 = arith.mulf %289, %265 : vector<2x32xf32>
    %301 = arith.mulf %281, %291 : vector<2x32xf32>
    %302 = arith.addf %300, %301 : vector<2x32xf32>
    %303 = math.tanh %302 : vector<2x32xf32>
    %304 = arith.mulf %299, %303 : vector<2x32xf32>
    %305 = vector.extract_strided_slice %45 {offsets = [0, 0], sizes = [1, 32], strides = [1, 1]} : vector<2x32xf32> to vector<1x32xf32>
    %306 = vector.extract_strided_slice %82 {offsets = [0, 0], sizes = [1, 32], strides = [1, 1]} : vector<2x32xf32> to vector<1x32xf32>
    %307 = vector.extract_strided_slice %119 {offsets = [0, 0], sizes = [1, 32], strides = [1, 1]} : vector<2x32xf32> to vector<1x32xf32>
    %308 = vector.extract_strided_slice %156 {offsets = [0, 0], sizes = [1, 32], strides = [1, 1]} : vector<2x32xf32> to vector<1x32xf32>
    %309 = vector.extract_strided_slice %193 {offsets = [0, 0], sizes = [1, 32], strides = [1, 1]} : vector<2x32xf32> to vector<1x32xf32>
    %310 = vector.extract_strided_slice %230 {offsets = [0, 0], sizes = [1, 32], strides = [1, 1]} : vector<2x32xf32> to vector<1x32xf32>
    %311 = vector.extract_strided_slice %267 {offsets = [0, 0], sizes = [1, 32], strides = [1, 1]} : vector<2x32xf32> to vector<1x32xf32>
    %312 = vector.extract_strided_slice %304 {offsets = [0, 0], sizes = [1, 32], strides = [1, 1]} : vector<2x32xf32> to vector<1x32xf32>
    %313 = vector.extract_strided_slice %45 {offsets = [1, 0], sizes = [1, 32], strides = [1, 1]} : vector<2x32xf32> to vector<1x32xf32>
    %314 = vector.extract_strided_slice %82 {offsets = [1, 0], sizes = [1, 32], strides = [1, 1]} : vector<2x32xf32> to vector<1x32xf32>
    %315 = vector.extract_strided_slice %119 {offsets = [1, 0], sizes = [1, 32], strides = [1, 1]} : vector<2x32xf32> to vector<1x32xf32>
    %316 = vector.extract_strided_slice %156 {offsets = [1, 0], sizes = [1, 32], strides = [1, 1]} : vector<2x32xf32> to vector<1x32xf32>
    %317 = vector.extract_strided_slice %193 {offsets = [1, 0], sizes = [1, 32], strides = [1, 1]} : vector<2x32xf32> to vector<1x32xf32>
    %318 = vector.extract_strided_slice %230 {offsets = [1, 0], sizes = [1, 32], strides = [1, 1]} : vector<2x32xf32> to vector<1x32xf32>
    %319 = vector.extract_strided_slice %267 {offsets = [1, 0], sizes = [1, 32], strides = [1, 1]} : vector<2x32xf32> to vector<1x32xf32>
    %320 = vector.extract_strided_slice %304 {offsets = [1, 0], sizes = [1, 32], strides = [1, 1]} : vector<2x32xf32> to vector<1x32xf32>
    %321 = tpu.concatenate %305, %306, %307, %308, %309, %310, %311, %312, %313, %314, %315, %316, %317, %318, %319, %320 in 0 : vector<1x32xf32>, vector<1x32xf32>, vector<1x32xf32>, vector<1x32xf32>, vector<1x32xf32>, vector<1x32xf32>, vector<1x32xf32>, vector<1x32xf32>, vector<1x32xf32>, vector<1x32xf32>, vector<1x32xf32>, vector<1x32xf32>, vector<1x32xf32>, vector<1x32xf32>, vector<1x32xf32>, vector<1x32xf32> -> vector<16x32xf32>
    %c0_122 = arith.constant 0 : index
    %c0_123 = arith.constant 0 : index
    %322 = vector.load %arg4[%c0_122, %c0_123] : memref<32x8xf32, #tpu.memory_space<vmem>>, vector<32x8xf32>
    %cst_124 = arith.constant dense<0.000000e+00> : vector<16x8xf32>
    %323 = tpu.matmul %321, %322, %cst_124 {dimension_numbers = #tpu.dot_dimension_numbers<[1], [0], [0], [1], [0, 0, 1, 1], [], []>} : vector<16x32xf32>, vector<32x8xf32>, vector<16x8xf32> -> vector<16x8xf32>
    %c0_125 = arith.constant 0 : index
    %c0_126 = arith.constant 0 : index
    %324 = vector.load %arg5[%c0_125, %c0_126] : memref<1x8xf32, #tpu.memory_space<vmem>>, vector<1x8xf32>
    %325 = vector.broadcast %324 : vector<1x8xf32> to vector<16x8xf32>
    %326 = arith.addf %323, %325 : vector<16x8xf32>
    %cst_127 = arith.constant 5.000000e-01 : f32
    %327 = vector.broadcast %cst_127 : f32 to vector<16x8xf32>
    %328 = arith.mulf %327, %326 : vector<16x8xf32>
    %329 = math.tanh %328 : vector<16x8xf32>
    %cst_128 = arith.constant 5.000000e-01 : f32
    %330 = vector.broadcast %cst_128 : f32 to vector<16x8xf32>
    %331 = arith.mulf %330, %329 : vector<16x8xf32>
    %cst_129 = arith.constant 5.000000e-01 : f32
    %332 = vector.broadcast %cst_129 : f32 to vector<16x8xf32>
    %333 = arith.addf %331, %332 : vector<16x8xf32>
    %c0_130 = arith.constant 0 : index
    %c0_131 = arith.constant 0 : index
    %334 = vector.load %arg6[%c0_130, %c0_131] : memref<16x8xf32, #tpu.memory_space<vmem>>, vector<16x8xf32>
    tpu.vector_store %arg6[%c0_130, %c0_131], %333 {strides = array<i32>} : memref<16x8xf32, #tpu.memory_space<vmem>>, vector<16x8xf32>,
    return
  }
}

</mosaic_0001>

<bundles_post_ra>
// kernel: lstm_forward.1
= control target key start
LH: loop header
LB: loop body
LE: loop exit
PB: predicated region body
PF: predicated region fallthrough
CT: control target
= control target key end

     0   :  { %11 = vsyncpa [#allocation4], 0  ;;  %s1702_s0 = inlined_call_operand.vmem [shape: f32[16,16], index: 0, kind: input, shape index: {}]   ;;  %s1703_s1 = inlined_call_operand.hbm [shape: f32[16,128], index: 1, kind: input, shape index: {}]   ;;  %s1704_s2 = inlined_call_operand.vmem [shape: f32[32,128], index: 2, kind: input, shape index: {}]   ;;  %s1705_s3 = inlined_call_operand.vmem [shape: f32[1,128], index: 3, kind: input, shape index: {}]   ;;  %s1706_s4 = inlined_call_operand.vmem [shape: f32[32,8], index: 4, kind: input, shape index: {}]   ;;  %s1707_s5 = inlined_call_operand.vmem [shape: f32[1,8], index: 5, kind: input, shape index: {}]   ;;  %s1708_s6 = inlined_call_operand.hbm [shape: f32[16,8], index: 6, kind: output, shape index: {}]  }
   0x1   :  { %12 = vsyncpa [#allocation5], 0  ;;  %s1480_s21 = smov [#allocation3]   ;;  %s1432_s25 = scalar_lea.hbm %s1703_s1, 256 }
   0x2   :  { %s20_s22 = sshll.u32 %s1480_s21, 4  ;;  %p1433_p0 = scmp.ne.s32.totalorder %s1703_s1, %s1432_s25  ;;  %s21_s22 = int_to_ptr.vmem [resolvable:$true] %s20_s22 }
   0x3   :  { %p1436_p1 = scmp.lt.u32.totalorder %s1432_s25, %s1703_s1 }
   0x5   :  { %p1438_p2 = pnand %p1436_p1, %p1433_p0 }
   0x7   :  { %1441 = shalt.err (!%p1438_p2)
}
   0x8   :  { %s1442_s30 = scalar_lea.vmem %s21_s22, 256  ;;  %p1447_p4 = scmp.lt.s32.totalorder %s21_s22, %s21_s22 }
   0x9   :  { %p1443_p3 = scmp.ne.s32.totalorder %s21_s22, %s1442_s30  ;;  %p1448_p5 = scmp.lt.s32.totalorder %s1442_s30, %s1442_s30 }
   0xb   :  { %p1449_p6 = por %p1448_p5, %p1447_p4 }
   0xd   :  { %p1450_p7 = pnand %p1449_p6, %p1443_p3 }
   0xf   :  { %1453 = shalt.err (!%p1450_p7)
}
  0x10   :  { %s1481_s7 = smov 128   ;;  %s1482_s8 = smov 8  }
  0x11   :  { %26 = dma.hbm_to_vmem [thread:$0]  %s1703_s1, 256, %s21_s22, [#allocation4], %s1481_s7, %s1481_s7, %s1482_s8  }
  0x12   :  { %1476 = dma.done.wait [#allocation4], 256  }
  0x13   :  { %1477 = vsyncadd [#allocation4], 4294967040  ;;  %v1483_v0 = vmov 0.0|0.0   ;;  %vm1484_vm0 = vmmov 0   ;;  %v1485_v1 = vmov 0.0   ;;  %vm49_vm1 = vcmask 130048  }
  0x14   :  { %1315 = vmatprep.subr.bf16.mxu1 %v1483_v0  ;;  %1220 = vmatprep.mubr.msk.f32.mxu1 %vm1484_vm0, %v1485_v1  ;;  %v40_v2 = vld [vmem:[#allocation3] sm:$0xff]  ;;  %v41_v3 = vld [vmem:[#allocation3 + $0x8] sm:$0xff]  ;;  %v38_v4 = vld [vmem:[%s1702_s0] sm:$0xff]  ;;  %vm138_vm2 = vcmask 1040384   ;;  %s1486_s22 = smov 64   ;;  %vm144_vm3 = vcmask 261120  }
  0x15   :  { %v1311_v5 = vpack.c.bf16 %v41_v3, %v40_v2  ;;  %1209 = vmatprep.mubr.msk.f32.mxu0 %vm49_vm1, %v38_v4  ;;  %v140_v6 = vld [vmem:[%s1704_s2] sm:$0xff]  ;;  %v141_v7 = vld [vmem:[%s1704_s2 + $0x8] sm:$0xff]  ;;  %v142_v9 = vld [vmem:[%s1704_s2 + $0x10] sm:$0xff]  ;;  %vm999_vm4 = vcmask 1041408   ;;  %vm1001_vm5 = vcmask 1042432   ;;  %vm1003_vm6 = vcmask 1043456  }
  0x16   :  { %v1552_v8 = vpack.c.bf16 %v141_v7, %v140_v6  ;;  %v143_v10 = vld [vmem:[%s1704_s2 + $0x18] sm:$0xff]  ;;  %v39_v11 = vld [vmem:[%s1702_s0 + $0x8] sm:$0xff]  ;;  %v1142_v13 = vld [vmem:[%s1705_s3] ss:$0 sm:$0xff]  ;;  %s1487_s3 = smov 32   ;;  %vm1005_vm7 = vcmask 1044480  }
  0x17   :  { %1312 = vmatprep.subr.bf16.mxu0 %v1311_v5  ;;  %v1564_v12 = vpack.c.bf16 %v143_v10, %v142_v9  ;;  %vm1007_vm8 = vcmask 1045504   ;;  %vm1009_vm9 = vcmask 1046528   ;;  %s1488_s10 = smov [#allocation6]   ;;  %vm1122_vm10 = vcmask 64512  }
  0x18   :  { %1314 = vmatpush3.bf16.msra.mxu0 %v1311_v5  ;;  %1317 = vmatpush3.bf16.msra.mxu1 %v1552_v8  ;;  %s1130_s11 = sshll.u32 %s1488_s10, 4  ;;  %s1131_s11 = int_to_ptr.vmem [resolvable:$true] %s1130_s11 }
  0x19   :  { %1318 = vmatprep.subr.bf16.mxu1 %v1483_v0  ;;  %1321 = vmatprep.subr.bf16.mxu0 %v1483_v0  ;;  %p1459_p9 = scmp.lt.s32.totalorder %s1131_s11, %s1131_s11 }
  0x1b   :  { %1210 = vmatmul.mubr.msk.f32.vlgmr.msra.gmra.mrb[0].mxu0 %vm49_vm1, %v39_v11 }
  0x1c   :  { %1320 = vmatpush3.bf16.msra.mxu1 %v1564_v12  ;;  %1323 = vmatpush3.bf16.msra.mxu0 %v1552_v8 }
  0x1d   :  { %1324 = vmatprep.subr.bf16.mxu0 %v1483_v0  ;;  %1231 = vmatprep.mubr.msk.f32.mxu0 %vm1484_vm0, %v1485_v1 }
  0x1e   :  { %1327 = vmatprep.subr.bf16.mxu1 %v1483_v0 }
  0x1f   :  { %1221 = vmatmul.mubr.f32.vlgmr.msra.gmra.mrb[0].mxu1 %v1485_v1 }
  0x20   :  { %1326 = vmatpush3.bf16.msra.mxu0 %v1564_v12  ;;  %1329 = vmatpush3.bf16.msra.mxu1 %v1552_v8 }
  0x21   :  { %1330 = vmatprep.subr.bf16.mxu1 %v1483_v0  ;;  %1242 = vmatprep.mubr.msk.f32.mxu1 %vm1484_vm0, %v1485_v1 }
  0x22   :  { %1333 = vmatprep.subr.bf16.mxu0 %v1483_v0 }
  0x24   :  { %1332 = vmatpush3.bf16.msra.mxu1 %v1564_v12 }
  0x25   :  { %1339 = vmatprep.subr.bf16.mxu1 %v1483_v0 }
  0xee   :  { %v1211_v14 = vpop.f32.mrb[0].mxu0 }
  0xef   :  { %v128_v15 = vadd.f32 %v1211_v14, %v1142_v13  ;;  %v122_v16 = vpop.f32.mrb[1].mxu0 }
  0xf0   :  { %v123_v17 = vadd.f32 %v1142_v13, %v122_v16 }
  0xf1   :  { %132 = vst [vmem:[#allocation2 + $0x8] sm:$0xff] %v128_v15 }
  0xf2   :  { %131 = vst [vmem:[#allocation2] sm:$0xff] %v123_v17  ;;  %v214_v18 = vpop.f32.mrb[0].mxu1 }
  0xf3   :  { %v1222_v19 = vpop.f32.mrb[1].mxu1 }
  0xf8   :  { %v134_v20 = vld [vmem:[#allocation2 + $0x8] sm:$0x1]  ;;  %v242_v39 = vld [vmem:[#allocation2 + $0x9] sm:$0x1]  ;;  %v346_v60 = vld [vmem:[#allocation2 + $0xa] sm:$0x1] }
  0xf9   :  { %v133_v21 = vld [vmem:[#allocation2] sm:$0x1]  ;;  %v136_v22 = vrot.slane %v134_v20, 7  ;;  %v244_v40 = vrot.slane %v242_v39, 7  ;;  %v241_v41 = vld [vmem:[#allocation2 + $0x1] sm:$0x1] }
  0xfa   :  { %v348_v61 = vrot.slane %v346_v60, 7  ;;  %v345_v62 = vld [vmem:[#allocation2 + $0x2] sm:$0x1] }
  0xfb   :  { %v139_v23 = vsel %vm138_vm2, %v133_v21, %v136_v22  ;;  %v246_v42 = vsel %vm138_vm2, %v241_v41, %v244_v40 }
  0xfc   :  { %v218_v24 = vadd.f32 %v214_v18, %v139_v23  ;;  %v350_v63 = vsel %vm138_vm2, %v345_v62, %v348_v61 }
  0xfe   :  { %1380 = vtanh.f32 %v218_v24  ;;  %v219_v26 = vmul.f32 0.5, %v218_v24 }
 0x100   :  { %1382 = vtanh.f32 %v219_v26 }
 0x108   :  { %v1381_v25 = vpop.eup %1380 }
 0x109   :  { %226 = vrot.lane.b32.xlu0 %v1381_v25, %s1486_s22 }
 0x10a   :  { %v1383_v27 = vpop.eup %1382 }
 0x10b   :  { %v221_v28 = vmul.f32 0.5, %v1383_v27 }
 0x10d   :  { %v222_v29 = vadd.f32 0.5, %v221_v28 }
 0x10f   :  { %v224_v32 = vmul.f32 0.0, %v222_v29 }
 0x17b   :  { %v227_v30 = vpop.permute.xlu0 %226 }
 0x17c   :  { %v229_v31 = vmul.f32 %v227_v30, %v222_v29 }
 0x17e   :  { %231 = vrot.lane.b32.xlu0 %v229_v31, %s1487_s3  ;;  %v449_v31 = vld [vmem:[#allocation2 + $0x3] sm:$0x1] }
 0x1f0   :  { %v232_v33 = vpop.permute.xlu0 %231 }
 0x1f1   :  { %v234_v34 = vadd.f32 %v232_v33, %v224_v32 }
 0x1f3   :  { %1384 = vtanh.f32 %v234_v34 }
 0x1fd   :  { %v1385_v35 = vpop.eup %1384 }
 0x1fe   :  { %237 = vrot.lane.b32.xlu1 %v1385_v35, %s1486_s22 }
 0x270   :  { %v238_v36 = vpop.permute.xlu1 %237 }
 0x271   :  { %v1591_v37 = vmul.f32 %v238_v36, %v222_v29  ;;  %v450_v29 = vld [vmem:[#allocation2 + $0xb] sm:$0x1] }
 0x272   :  { %v452_v30 = vrot.slane %v450_v29, 7 }
 0x273   :  { %248 = vrot.lane.b32.xlu1 %v1591_v37, %s1487_s3  ;;  %v984_v21 = vrot.slane %v1591_v37, 1 }
 0x274   :  { %v454_v32 = vsel %vm138_vm2, %v449_v31, %v452_v30 }
 0x2e5   :  { %v249_v38 = vpop.permute.xlu1 %248 }
 0x2e6   :  { %1232 = vmatmul.mubr.msk.f32.vlgmr.msra.gmra.mrb[2].mxu0 %vm144_vm3, %v249_v38 }
 0x2e7   :  { %1335 = vmatpush3.bf16.msra.mxu0 %v1552_v8  ;;  %1253 = vmatprep.mubr.msk.f32.mxu0 %vm1484_vm0, %v1485_v1 }
 0x2e8   :  { %1336 = vmatprep.subr.bf16.mxu0 %v1483_v0 }
 0x2eb   :  { %1338 = vmatpush3.bf16.msra.mxu0 %v1564_v12 }
 0x2ec   :  { %1345 = vmatprep.subr.bf16.mxu0 %v1483_v0 }
 0x3b9   :  { %v318_v43 = vpop.f32.mrb[2].mxu0 }
 0x3ba   :  { %v322_v44 = vadd.f32 %v318_v43, %v246_v42  ;;  %v1233_v45 = vpop.f32.mrb[3].mxu0 }
 0x3bc   :  { %1386 = vtanh.f32 %v322_v44  ;;  %v323_v47 = vmul.f32 0.5, %v322_v44 }
 0x3be   :  { %1388 = vtanh.f32 %v323_v47 }
 0x3c6   :  { %v1387_v46 = vpop.eup %1386 }
 0x3c7   :  { %330 = vrot.lane.b32.xlu0 %v1387_v46, %s1486_s22 }
 0x3c8   :  { %v1389_v48 = vpop.eup %1388 }
 0x3c9   :  { %v325_v49 = vmul.f32 0.5, %v1389_v48 }
 0x3cb   :  { %v326_v50 = vadd.f32 0.5, %v325_v49 }
 0x3cd   :  { %v328_v53 = vmul.f32 %v326_v50, %v234_v34 }
 0x439   :  { %v331_v51 = vpop.permute.xlu0 %330 }
 0x43a   :  { %v333_v52 = vmul.f32 %v331_v51, %v326_v50 }
 0x43c   :  { %335 = vrot.lane.b32.xlu1 %v333_v52, %s1487_s3 }
 0x4ae   :  { %v336_v54 = vpop.permute.xlu1 %335 }
 0x4af   :  { %v338_v55 = vadd.f32 %v336_v54, %v328_v53  ;;  %v554_v54 = vld [vmem:[#allocation2 + $0xc] sm:$0x1] }
 0x4b1   :  { %1390 = vtanh.f32 %v338_v55 }
 0x4bb   :  { %v1391_v56 = vpop.eup %1390 }
 0x4bc   :  { %341 = vrot.lane.b32.xlu0 %v1391_v56, %s1486_s22  ;;  %v553_v56 = vld [vmem:[#allocation2 + $0x4] sm:$0x1] }
 0x52e   :  { %v342_v57 = vpop.permute.xlu0 %341 }
 0x52f   :  { %v344_v58 = vmul.f32 %v342_v57, %v326_v50 }
 0x531   :  { %352 = vrot.lane.b32.xlu1 %v344_v58, %s1487_s3  ;;  %v969_v18 = vrot.slane %v344_v58, 7  ;;  %v1011_v25 = vsel %vm138_vm2, %v984_v21, %v344_v58  ;;  %v657_v21 = vld [vmem:[#allocation2 + $0x5] sm:$0x1] }
 0x533   :  { %v998_v24 = vsel %vm138_vm2, %v1591_v37, %v969_v18 }
 0x5a3   :  { %v353_v59 = vpop.permute.xlu1 %352 }
 0x5a4   :  { %1243 = vmatmul.mubr.msk.f32.vlgmr.msra.gmra.mrb[2].mxu1 %vm144_vm3, %v353_v59 }
 0x5a5   :  { %1341 = vmatpush3.bf16.msra.mxu1 %v1552_v8  ;;  %1264 = vmatprep.mubr.msk.f32.mxu1 %vm1484_vm0, %v1485_v1 }
 0x5a6   :  { %1342 = vmatprep.subr.bf16.mxu1 %v1483_v0 }
 0x5a9   :  { %1344 = vmatpush3.bf16.msra.mxu1 %v1564_v12 }
 0x5aa   :  { %1351 = vmatprep.subr.bf16.mxu1 %v1483_v0 }
 0x677   :  { %v422_v2 = vpop.f32.mrb[2].mxu1 }
 0x678   :  { %v426_v3 = vadd.f32 %v422_v2, %v350_v63  ;;  %v1244_v4 = vpop.f32.mrb[3].mxu1 }
 0x67a   :  { %1392 = vtanh.f32 %v426_v3  ;;  %v427_v6 = vmul.f32 0.5, %v426_v3 }
 0x67c   :  { %1394 = vtanh.f32 %v427_v6 }
 0x684   :  { %v1393_v5 = vpop.eup %1392 }
 0x685   :  { %434 = vrot.lane.b32.xlu0 %v1393_v5, %s1486_s22 }
 0x686   :  { %v1395_v7 = vpop.eup %1394 }
 0x687   :  { %v429_v9 = vmul.f32 0.5, %v1395_v7 }
 0x689   :  { %v430_v10 = vadd.f32 0.5, %v429_v9 }
 0x68b   :  { %v432_v14 = vmul.f32 %v430_v10, %v338_v55  ;;  %v556_v55 = vrot.slane %v554_v54, 7 }
 0x68d   :  { %v558_v57 = vsel %vm138_vm2, %v553_v56, %v556_v55 }
 0x6f7   :  { %v435_v11 = vpop.permute.xlu0 %434 }
 0x6f8   :  { %v437_v13 = vmul.f32 %v435_v11, %v430_v10 }
 0x6fa   :  { %439 = vrot.lane.b32.xlu1 %v437_v13, %s1487_s3 }
 0x76c   :  { %v440_v15 = vpop.permute.xlu1 %439 }
 0x76d   :  { %v442_v16 = vadd.f32 %v440_v15, %v432_v14 }
 0x76f   :  { %1396 = vtanh.f32 %v442_v16 }
 0x779   :  { %v1397_v17 = vpop.eup %1396 }
 0x77a   :  { %445 = vrot.lane.b32.xlu0 %v1397_v17, %s1486_s22 }
 0x7ec   :  { %v446_v19 = vpop.permute.xlu0 %445 }
 0x7ed   :  { %v448_v20 = vmul.f32 %v446_v19, %v430_v10  ;;  %v658_v19 = vld [vmem:[#allocation2 + $0xd] sm:$0x1] }
 0x7ef   :  { %v971_v22 = vrot.slane %v448_v20, 6  ;;  %v986_v23 = vrot.slane %v448_v20, 7  ;;  %456 = vrot.lane.b32.xlu1 %v448_v20, %s1487_s3  ;;  %v660_v20 = vrot.slane %v658_v19, 7 }
 0x7f1   :  { %v1000_v26 = vsel %vm999_vm4, %v998_v24, %v971_v22  ;;  %v1012_v27 = vsel %vm999_vm4, %v1011_v25, %v986_v23  ;;  %v662_v22 = vsel %vm138_vm2, %v657_v21, %v660_v20 }
 0x861   :  { %v457_v28 = vpop.permute.xlu1 %456 }
 0x862   :  { %1254 = vmatmul.mubr.msk.f32.vlgmr.msra.gmra.mrb[4].mxu0 %vm144_vm3, %v457_v28 }
 0x863   :  { %1347 = vmatpush3.bf16.msra.mxu0 %v1552_v8  ;;  %1275 = vmatprep.mubr.msk.f32.mxu0 %vm1484_vm0, %v1485_v1 }
 0x864   :  { %1348 = vmatprep.subr.bf16.mxu0 %v1483_v0 }
 0x867   :  { %1350 = vmatpush3.bf16.msra.mxu0 %v1564_v12 }
 0x868   :  { %1357 = vmatprep.subr.bf16.mxu0 %v1483_v0 }
 0x935   :  { %v526_v33 = vpop.f32.mrb[4].mxu0 }
 0x936   :  { %v530_v34 = vadd.f32 %v526_v33, %v454_v32  ;;  %v1255_v35 = vpop.f32.mrb[5].mxu0 }
 0x938   :  { %1398 = vtanh.f32 %v530_v34  ;;  %v531_v37 = vmul.f32 0.5, %v530_v34 }
 0x93a   :  { %1400 = vtanh.f32 %v531_v37 }
 0x942   :  { %v1399_v36 = vpop.eup %1398 }
 0x943   :  { %538 = vrot.lane.b32.xlu0 %v1399_v36, %s1486_s22 }
 0x944   :  { %v1401_v38 = vpop.eup %1400 }
 0x945   :  { %v533_v39 = vmul.f32 0.5, %v1401_v38 }
 0x947   :  { %v534_v40 = vadd.f32 0.5, %v533_v39 }
 0x949   :  { %v536_v43 = vmul.f32 %v534_v40, %v442_v16 }
 0x9b5   :  { %v539_v41 = vpop.permute.xlu0 %538 }
 0x9b6   :  { %v541_v42 = vmul.f32 %v539_v41, %v534_v40 }
 0x9b8   :  { %543 = vrot.lane.b32.xlu1 %v541_v42, %s1487_s3  ;;  %v761_v42 = vld [vmem:[#allocation2 + $0x6] sm:$0x1] }
 0xa2a   :  { %v544_v44 = vpop.permute.xlu1 %543 }
 0xa2b   :  { %v546_v45 = vadd.f32 %v544_v44, %v536_v43 }
 0xa2d   :  { %1402 = vtanh.f32 %v546_v45 }
 0xa37   :  { %v1403_v46 = vpop.eup %1402 }
 0xa38   :  { %549 = vrot.lane.b32.xlu0 %v1403_v46, %s1486_s22 }
 0xaaa   :  { %v550_v47 = vpop.permute.xlu0 %549 }
 0xaab   :  { %v552_v48 = vmul.f32 %v550_v47, %v534_v40  ;;  %v762_v40 = vld [vmem:[#allocation2 + $0xe] sm:$0x1] }
 0xaac   :  { %v764_v41 = vrot.slane %v762_v40, 7 }
 0xaad   :  { %v973_v49 = vrot.slane %v552_v48, 5  ;;  %v988_v50 = vrot.slane %v552_v48, 6  ;;  %560 = vrot.lane.b32.xlu1 %v552_v48, %s1487_s3 }
 0xaae   :  { %v766_v43 = vsel %vm138_vm2, %v761_v42, %v764_v41 }
 0xaaf   :  { %v1002_v51 = vsel %vm1001_vm5, %v1000_v26, %v973_v49  ;;  %v1013_v52 = vsel %vm1001_vm5, %v1012_v27, %v988_v50 }
 0xb1f   :  { %v561_v53 = vpop.permute.xlu1 %560 }
 0xb20   :  { %1265 = vmatmul.mubr.msk.f32.vlgmr.msra.gmra.mrb[4].mxu1 %vm144_vm3, %v561_v53 }
 0xb21   :  { %1353 = vmatpush3.bf16.msra.mxu1 %v1552_v8  ;;  %1286 = vmatprep.mubr.msk.f32.mxu1 %vm1484_vm0, %v1485_v1 }
 0xb22   :  { %1354 = vmatprep.subr.bf16.mxu1 %v1483_v0 }
 0xb25   :  { %1356 = vmatpush3.bf16.msra.mxu1 %v1564_v12 }
 0xbf3   :  { %v630_v58 = vpop.f32.mrb[4].mxu1 }
 0xbf4   :  { %v634_v59 = vadd.f32 %v630_v58, %v558_v57  ;;  %v1266_v60 = vpop.f32.mrb[5].mxu1 }
 0xbf6   :  { %1404 = vtanh.f32 %v634_v59  ;;  %v635_v62 = vmul.f32 0.5, %v634_v59 }
 0xbf8   :  { %1406 = vtanh.f32 %v635_v62 }
 0xc00   :  { %v1405_v61 = vpop.eup %1404 }
 0xc01   :  { %642 = vrot.lane.b32.xlu0 %v1405_v61, %s1486_s22 }
 0xc02   :  { %v1407_v63 = vpop.eup %1406 }
 0xc03   :  { %v637_v2 = vmul.f32 0.5, %v1407_v63 }
 0xc05   :  { %v638_v3 = vadd.f32 0.5, %v637_v2 }
 0xc07   :  { %v640_v6 = vmul.f32 %v638_v3, %v546_v45 }
 0xc73   :  { %v643_v4 = vpop.permute.xlu0 %642 }
 0xc74   :  { %v645_v5 = vmul.f32 %v643_v4, %v638_v3 }
 0xc76   :  { %647 = vrot.lane.b32.xlu1 %v645_v5, %s1487_s3  ;;  %v865_v5 = vld [vmem:[#allocation2 + $0x7] sm:$0x1] }
 0xce8   :  { %v648_v7 = vpop.permute.xlu1 %647 }
 0xce9   :  { %v650_v9 = vadd.f32 %v648_v7, %v640_v6 }
 0xceb   :  { %1408 = vtanh.f32 %v650_v9 }
 0xcf5   :  { %v1409_v10 = vpop.eup %1408 }
 0xcf6   :  { %653 = vrot.lane.b32.xlu0 %v1409_v10, %s1486_s22 }
 0xd68   :  { %v654_v11 = vpop.permute.xlu0 %653 }
 0xd69   :  { %v656_v13 = vmul.f32 %v654_v11, %v638_v3  ;;  %v866_v3 = vld [vmem:[#allocation2 + $0xf] sm:$0x1] }
 0xd6a   :  { %v868_v4 = vrot.slane %v866_v3, 7 }
 0xd6b   :  { %v975_v14 = vrot.slane %v656_v13, 4  ;;  %v990_v15 = vrot.slane %v656_v13, 5  ;;  %664 = vrot.lane.b32.xlu1 %v656_v13, %s1487_s3 }
 0xd6c   :  { %v870_v6 = vsel %vm138_vm2, %v865_v5, %v868_v4 }
 0xd6d   :  { %v1004_v16 = vsel %vm1003_vm6, %v1002_v51, %v975_v14  ;;  %v1014_v17 = vsel %vm1003_vm6, %v1013_v52, %v990_v15 }
 0xddd   :  { %v665_v18 = vpop.permute.xlu1 %664 }
 0xdde   :  { %1276 = vmatmul.mubr.msk.f32.vlgmr.msra.gmra.mrb[6].mxu0 %vm144_vm3, %v665_v18 }
 0xddf   :  { %1359 = vmatpush3.bf16.msra.mxu0 %v1552_v8  ;;  %1297 = vmatprep.mubr.msk.f32.mxu0 %vm1484_vm0, %v1485_v1 }
 0xde0   :  { %1360 = vmatprep.subr.bf16.mxu0 %v1483_v0 }
 0xde3   :  { %1362 = vmatpush3.bf16.msra.mxu0 %v1564_v12 }
 0xeb1   :  { %v734_v23 = vpop.f32.mrb[6].mxu0 }
 0xeb2   :  { %v738_v24 = vadd.f32 %v734_v23, %v662_v22  ;;  %v1277_v25 = vpop.f32.mrb[7].mxu0  ;;  %v1018_v22 = vld [vmem:[%s1706_s4] sm:$0xff]  ;;  %v1019_v23 = vld [vmem:[%s1706_s4 + $0x8] sm:$0xff] }
 0xeb3   :  { %v1363_v25 = vpack.c.bf16 %v1019_v23, %v1018_v22 }
 0xeb4   :  { %1410 = vtanh.f32 %v738_v24  ;;  %v739_v8 = vmul.f32 0.5, %v738_v24  ;;  %v1020_v24 = vld [vmem:[%s1706_s4 + $0x10] sm:$0xff] }
 0xeb5   :  { %1364 = vmatprep.subr.bf16.mxu1 %v1363_v25 }
 0xeb6   :  { %1412 = vtanh.f32 %v739_v8 }
 0xebe   :  { %v1411_v26 = vpop.eup %1410 }
 0xebf   :  { %746 = vrot.lane.b32.xlu0 %v1411_v26, %s1486_s22  ;;  %v1021_v26 = vld [vmem:[%s1706_s4 + $0x18] sm:$0xff] }
 0xec0   :  { %v1413_v27 = vpop.eup %1412  ;;  %v1367_v8 = vpack.c.bf16 %v1021_v26, %v1020_v24 }
 0xec1   :  { %v741_v1 = vmul.f32 0.5, %v1413_v27 }
 0xec3   :  { %v742_v28 = vadd.f32 0.5, %v741_v1 }
 0xec5   :  { %v744_v12 = vmul.f32 %v742_v28, %v650_v9 }
 0xf31   :  { %v747_v0 = vpop.permute.xlu0 %746 }
 0xf32   :  { %v749_v29 = vmul.f32 %v747_v0, %v742_v28 }
 0xf34   :  { %751 = vrot.lane.b32.xlu1 %v749_v29, %s1487_s3 }
 0xfa6   :  { %v752_v30 = vpop.permute.xlu1 %751 }
 0xfa7   :  { %v754_v31 = vadd.f32 %v752_v30, %v744_v12 }
 0xfa9   :  { %1414 = vtanh.f32 %v754_v31 }
 0xfb3   :  { %v1415_v32 = vpop.eup %1414 }
 0xfb4   :  { %757 = vrot.lane.b32.xlu0 %v1415_v32, %s1486_s22 }
0x1026   :  { %v758_v33 = vpop.permute.xlu0 %757 }
0x1027   :  { %v760_v34 = vmul.f32 %v758_v33, %v742_v28  ;;  %v1152_v33 = vld [vmem:[%s1707_s5] ss:$0 sm:$0xff]  ;;  %s1454_s5 = scalar_lea.vmem %s1131_s11, 256 }
0x1028   :  { %p1455_p8 = scmp.ne.s32.totalorder %s1131_s11, %s1454_s5  ;;  %p1460_p10 = scmp.lt.s32.totalorder %s1454_s5, %s1454_s5 }
0x1029   :  { %v977_v35 = vrot.slane %v760_v34, 3  ;;  %v992_v36 = vrot.slane %v760_v34, 4  ;;  %768 = vrot.lane.b32.xlu1 %v760_v34, %s1487_s3 }
0x102a   :  { %p1461_p11 = por %p1460_p10, %p1459_p9 }
0x102b   :  { %v1006_v37 = vsel %vm1005_vm7, %v1004_v16, %v977_v35  ;;  %v1015_v38 = vsel %vm1005_vm7, %v1014_v17, %v992_v36 }
0x102c   :  { %p1462_p12 = pnand %p1461_p11, %p1455_p8 }
0x109b   :  { %v769_v39 = vpop.permute.xlu1 %768 }
0x109c   :  { %1287 = vmatmul.mubr.msk.f32.vlgmr.msra.gmra.mrb[6].mxu1 %vm144_vm3, %v769_v39 }
0x109d   :  { %1366 = vmatpush3.bf16.msra.mxu1 %v1363_v25 }
0x109e   :  { %1368 = vmatprep.subr.bf16.mxu1 %v1367_v8 }
0x10a1   :  { %1370 = vmatpush3.bf16.msra.mxu1 %v1367_v8 }
0x116f   :  { %v838_v44 = vpop.f32.mrb[6].mxu1 }
0x1170   :  { %v842_v45 = vadd.f32 %v838_v44, %v766_v43  ;;  %v1288_v46 = vpop.f32.mrb[7].mxu1 }
0x1172   :  { %1416 = vtanh.f32 %v842_v45  ;;  %v843_v48 = vmul.f32 0.5, %v842_v45 }
0x1174   :  { %1418 = vtanh.f32 %v843_v48 }
0x117c   :  { %v1417_v47 = vpop.eup %1416 }
0x117d   :  { %850 = vrot.lane.b32.xlu0 %v1417_v47, %s1486_s22 }
0x117e   :  { %v1419_v49 = vpop.eup %1418 }
0x117f   :  { %v845_v50 = vmul.f32 0.5, %v1419_v49 }
0x1181   :  { %v846_v51 = vadd.f32 0.5, %v845_v50 }
0x1183   :  { %v848_v54 = vmul.f32 %v846_v51, %v754_v31 }
0x11ef   :  { %v851_v52 = vpop.permute.xlu0 %850 }
0x11f0   :  { %v853_v53 = vmul.f32 %v851_v52, %v846_v51 }
0x11f2   :  { %855 = vrot.lane.b32.xlu1 %v853_v53, %s1487_s3 }
0x1264   :  { %v856_v55 = vpop.permute.xlu1 %855 }
0x1265   :  { %v858_v56 = vadd.f32 %v856_v55, %v848_v54 }
0x1267   :  { %1420 = vtanh.f32 %v858_v56 }
0x1271   :  { %v1421_v57 = vpop.eup %1420 }
0x1272   :  { %861 = vrot.lane.b32.xlu0 %v1421_v57, %s1486_s22 }
0x12e4   :  { %v862_v58 = vpop.permute.xlu0 %861 }
0x12e5   :  { %v864_v59 = vmul.f32 %v862_v58, %v846_v51 }
0x12e7   :  { %v979_v60 = vrot.slane %v864_v59, 2  ;;  %v994_v61 = vrot.slane %v864_v59, 3  ;;  %872 = vrot.lane.b32.xlu1 %v864_v59, %s1487_s3 }
0x12e9   :  { %v1008_v62 = vsel %vm1007_vm8, %v1006_v37, %v979_v60  ;;  %v1016_v63 = vsel %vm1007_vm8, %v1015_v38, %v994_v61 }
0x1359   :  { %v873_v2 = vpop.permute.xlu1 %872 }
0x135a   :  { %1298 = vmatmul.mubr.msk.f32.vlgmr.msra.gmra.mrb[8].mxu0 %vm144_vm3, %v873_v2 }
0x142d   :  { %v942_v7 = vpop.f32.mrb[8].mxu0 }
0x142e   :  { %v946_v9 = vadd.f32 %v942_v7, %v870_v6  ;;  %v1299_v10 = vpop.f32.mrb[9].mxu0 }
0x1430   :  { %1422 = vtanh.f32 %v946_v9  ;;  %v947_v13 = vmul.f32 0.5, %v946_v9 }
0x1432   :  { %1424 = vtanh.f32 %v947_v13 }
0x143a   :  { %v1423_v11 = vpop.eup %1422 }
0x143b   :  { %954 = vrot.lane.b32.xlu0 %v1423_v11, %s1486_s22 }
0x143c   :  { %v1425_v14 = vpop.eup %1424 }
0x143d   :  { %v949_v15 = vmul.f32 0.5, %v1425_v14 }
0x143f   :  { %v950_v16 = vadd.f32 0.5, %v949_v15 }
0x1441   :  { %v952_v19 = vmul.f32 %v950_v16, %v858_v56 }
0x14ad   :  { %v955_v17 = vpop.permute.xlu0 %954 }
0x14ae   :  { %v957_v18 = vmul.f32 %v955_v17, %v950_v16 }
0x14b0   :  { %959 = vrot.lane.b32.xlu1 %v957_v18, %s1487_s3 }
0x1522   :  { %v960_v20 = vpop.permute.xlu1 %959 }
0x1523   :  { %v962_v21 = vadd.f32 %v960_v20, %v952_v19 }
0x1525   :  { %1426 = vtanh.f32 %v962_v21 }
0x152f   :  { %v1427_v27 = vpop.eup %1426 }
0x1530   :  { %965 = vrot.lane.b32.xlu0 %v1427_v27, %s1486_s22 }
0x15a2   :  { %v966_v1 = vpop.permute.xlu0 %965 }
0x15a3   :  { %v968_v28 = vmul.f32 %v966_v1, %v950_v16 }
0x15a5   :  { %v982_v0 = vrot.slane %v968_v28, 1  ;;  %v996_v29 = vrot.slane %v968_v28, 2 }
0x15a7   :  { %v1010_v12 = vsel %vm1009_vm9, %v1008_v62, %v982_v0  ;;  %v1017_v30 = vsel %vm1009_vm9, %v1016_v63, %v996_v29 }
0x15a8   :  { %1031 = vrot.lane.b32.xlu1 %v1010_v12, %s1487_s3  ;;  %1033 = vrot.lane.b32.xlu0 %v1017_v30, %s1487_s3 }
0x161a   :  { %v1032_v31 = vpop.permute.xlu1 %1031  ;;  %v1034_v32 = vpop.permute.xlu0 %1033 }
0x161b   :  { %1308 = vmatprep.mubr.msk.f32.mxu1 %vm144_vm3, %v1032_v31 }
0x161c   :  { %1309 = vmatmul.mubr.msk.f32.vlgmr.msra.gmra.mrb[8].mxu1 %vm144_vm3, %v1034_v32 }
0x16ef   :  { %v1310_v34 = vpop.f32.mrb[8].mxu1 }
0x16f0   :  { %v1111_v35 = vadd.f32 %v1310_v34, %v1152_v33  ;;  %v1105_v36 = vpop.f32.mrb[9].mxu1 }
0x16f1   :  { %v1106_v37 = vadd.f32 %v1152_v33, %v1105_v36 }
0x16f2   :  { %v1115_v38 = vmul.f32 0.5, %v1111_v35 }
0x16f3   :  { %v1114_v39 = vmul.f32 0.5, %v1106_v37 }
0x16f4   :  { %1428 = vtanh.f32 %v1115_v38 }
0x16f5   :  { %1430 = vtanh.f32 %v1114_v39 }
0x16fe   :  { %v1429_v40 = vpop.eup %1428 }
0x16ff   :  { %v1431_v41 = vpop.eup %1430  ;;  %v1119_v42 = vmul.f32 0.5, %v1429_v40 }
0x1700   :  { %v1118_v43 = vmul.f32 0.5, %v1431_v41 }
0x1701   :  { %v1121_v44 = vadd.f32 0.5, %v1119_v42 }
0x1702   :  { %v1120_v45 = vadd.f32 0.5, %v1118_v43 }
0x1703   :  { %1124 = vst.msk [vmem:[#allocation6 + $0x8] sm:$0xff] %vm1122_vm10, %v1121_v44 }
0x1704   :  { %1123 = vst.msk [vmem:[#allocation6] sm:$0xff] %vm1122_vm10, %v1120_v45 }
0x1705   :  { %1465 = shalt.err (!%p1462_p12)
}
0x1706   :  { %s1466_s13 = scalar_lea.hbm %s1708_s6, 256 }
0x1707   :  { %p1467_p13 = scmp.ne.s32.totalorder %s1708_s6, %s1466_s13  ;;  %p1470_p0 = scmp.lt.u32.totalorder %s1466_s13, %s1708_s6 }
0x1709   :  { %p1472_p1 = pnand %p1470_p0, %p1467_p13 }
0x170b   :  { %1475 = shalt.err (!%p1472_p1)
}
0x170c   :  { %1136 = dma.vmem_to_hbm [thread:$0]  %s1131_s11, 256, %s1708_s6, [#allocation5], %s1481_s7, %s1481_s7, %s1482_s8  }
0x170d   :  { %1478 = dma.done.wait [#allocation5], 256  }
0x170e   :  { %1479 = vsyncadd [#allocation5], 4294967040 }
0x170f   :  { %1140 = vsyncpa [#allocation4], 1 }
0x1710   :  { %1141 = vsyncpa [#allocation5], 1 }

</bundles_post_ra>
